<compile_context>
chip_gen: v6e
topology: v6e:2x2x1
jax: 0.10.0
libtpu: 0.0.40
codegen_flags: <defaults>
</compile_context>

<pallas_src>
import jax
import jax.numpy as jnp
from jax.experimental import pallas as pl
from jax.experimental.pallas import tpu as pltpu

_LANES = 128


def _round_up(x, m):
    return ((x + m - 1) // m) * m


def _nn_exp_kernel(params_ref, x_ref, o_ref):
    # params_ref (SMEM, f32[13]): [w1_0..3, b1_0..3, w2_0..3, b2]
    # x_ref / o_ref (VMEM, f32[tile_rows, 128]): lane-dense batch tile.
    x = x_ref[...]
    acc = jnp.full(x.shape, params_ref[12], dtype=jnp.float32)   # b2
    for j in range(4):                                           # unrolled: 4 hidden units
        h = jnp.maximum(x * params_ref[j] + params_ref[4 + j], 0.0)
        acc = acc + params_ref[8 + j] * h
    o_ref[...] = acc


def nn_exp_forward(x, w1, b1, w2, b2, *, block_rows=8192):
    """Forward pass of NN_EXP.

    x:  [B, 1] float32
    w1: [1, 4], b1: [1, 4], w2: [4, 1], b2: [1, 1]   (W stored as [in, out])
    Returns [B, 1] float32.
    """
    B = x.shape[0]

    # Pack the 13 parameter scalars into one flat SMEM-resident array.
    params = jnp.concatenate(
        [w1.reshape(-1), b1.reshape(-1), w2.reshape(-1), b2.reshape(-1)]
    ).astype(jnp.float32)                                        # f32[13]

    # Lane-dense layout: batch -> [rows, 128]; pad only the tail of the last
    # row (<= 127 elements) instead of a full tile multiple.
    rows = pl.cdiv(B, _LANES)
    n_lane_dense = rows * _LANES

    # Balanced tiling: pick the grid count first, then size tiles so padding
    # waste is <= 7 rows per step and steps are even-sized (v7x 2-TC split).
    grid_n = pl.cdiv(rows, block_rows)
    tile_rows = min(block_rows, _round_up(pl.cdiv(rows, grid_n), 8))
    grid_n = pl.cdiv(rows, tile_rows)          # ragged last block handled by Pallas

    x_flat = x.reshape(-1).astype(jnp.float32)
    if n_lane_dense != B:
        x_flat = jnp.pad(x_flat, (0, n_lane_dense - B))
    x2d = x_flat.reshape(rows, _LANES)

    out2d = pl.pallas_call(
        _nn_exp_kernel,
        out_shape=jax.ShapeDtypeStruct((rows, _LANES), jnp.float32),
        grid_spec=pltpu.PrefetchScalarGridSpec(
            num_scalar_prefetch=0,
            grid=(grid_n,),
            in_specs=[
                pl.BlockSpec(memory_space=pltpu.MemorySpace.SMEM),    # params (whole array)
                pl.BlockSpec((tile_rows, _LANES), lambda i: (i, 0)),  # x tile
            ],
            out_specs=pl.BlockSpec((tile_rows, _LANES), lambda i: (i, 0)),
        ),
        compiler_params=pltpu.CompilerParams(
            dimension_semantics=("parallel",),
            # Let XLA fuse the pad/reshape producer into the x operand so the
            # lane-dense view is not materialized as an extra HBM copy.
            allow_input_fusion=[False, True],
            # 4 MiB tiles, double-buffered in+out = 16 MiB; raise v5e's 16 MiB
            # default scoped VMEM (safe on v6e/v7x as well).
            vmem_limit_bytes=32 * 1024 * 1024,
        ),
    )(params, x2d)

    out_flat = out2d.reshape(-1)
    if n_lane_dense != B:                      # only slice when padding existed
        out_flat = out_flat[:B]
    return out_flat.reshape(B, 1)


def init_params(key):
    # Deterministic init mimicking PyTorch's default Linear init:
    # U(-1/sqrt(fan_in), 1/sqrt(fan_in)).
    k1, k2, k3, k4 = jax.random.split(key, 4)
    bound1 = 1.0 / jnp.sqrt(1.0)   # fc1: fan_in = 1
    bound2 = 1.0 / jnp.sqrt(4.0)   # fc2: fan_in = 4
    w1 = jax.random.uniform(k1, (1, 4), jnp.float32, -bound1, bound1)  # [in, out]
    b1 = jax.random.uniform(k2, (1, 4), jnp.float32, -bound1, bound1)
    w2 = jax.random.uniform(k3, (4, 1), jnp.float32, -bound2, bound2)  # [in, out]
    b2 = jax.random.uniform(k4, (1, 1), jnp.float32, -bound2, bound2)
    return w1, b1, w2, b2


if __name__ == "__main__":
    key = jax.random.PRNGKey(0)
    k_x, k_x2, k_x3, k_p = jax.random.split(key, 4)

    w1, b1, w2, b2 = init_params(k_p)

    def ref_fwd(x):
        return jnp.maximum(x @ w1 + b1, 0.0) @ w2 + b2

    # Small batch (heavily padded, single ragged block).
    batch = 8
    x = jax.random.normal(k_x, (batch, 1), jnp.float32)
    out = jax.block_until_ready(nn_exp_forward(x, w1, b1, w2, b2))
    assert out.shape == (batch, 1)
    assert jnp.allclose(out, ref_fwd(x), atol=1e-5, rtol=1e-5)

    # Non-multiple-of-128 batch (exercises tail padding + slice correctness).
    batch2 = 333
    x2 = jax.random.normal(k_x2, (batch2, 1), jnp.float32)
    out2 = jax.block_until_ready(nn_exp_forward(x2, w1, b1, w2, b2))
    assert out2.shape == (batch2, 1)
    assert jnp.allclose(out2, ref_fwd(x2), atol=1e-5, rtol=1e-5)

    # Multiple-of-128 batch (no pad / no slice path).
    batch3 = 1024
    x3 = jax.random.normal(k_x3, (batch3, 1), jnp.float32)
    out3 = jax.block_until_ready(nn_exp_forward(x3, w1, b1, w2, b2))
    assert out3.shape == (batch3, 1)
    assert jnp.allclose(out3, ref_fwd(x3), atol=1e-5, rtol=1e-5)

    print("KERNEL_OK")
</pallas_src>

<mosaic_0001>
module attributes {stable_mosaic.version = 11 : i64} {
  func.func @_nn_exp_kernel(%arg0: i32, %arg1: memref<13xf32, #tpu.memory_space<smem>>, %arg2: memref<8x128xf32, #tpu.memory_space<vmem>>, %arg3: memref<8x128xf32, #tpu.memory_space<vmem>>) attributes {dimension_semantics = [#tpu.dimension_semantics<parallel>], iteration_bounds = array<i64: 1>, scalar_prefetch = 0 : i64, scratch_operands = 0 : i64, tpu.core_type = #tpu.core_type<tc>, window_params = [{transform_indices = @transform_0, window_bounds = array<i64: 13>}, {transform_indices = @transform_1, window_bounds = array<i64: 8, 128>}, {transform_indices = @transform_2, window_bounds = array<i64: 8, 128>}]} {
    %c0 = arith.constant 0 : index
    %c0_0 = arith.constant 0 : index
    %0 = vector.load %arg2[%c0, %c0_0] : memref<8x128xf32, #tpu.memory_space<vmem>>, vector<8x128xf32>
    %c12 = arith.constant 12 : index
    %1 = memref.load %arg1[%c12] : memref<13xf32, #tpu.memory_space<smem>>
    %2 = vector.broadcast %1 : f32 to vector<8x128xf32>
    %c0_1 = arith.constant 0 : index
    %3 = memref.load %arg1[%c0_1] : memref<13xf32, #tpu.memory_space<smem>>
    %4 = vector.broadcast %3 : f32 to vector<8x128xf32>
    %5 = arith.mulf %0, %4 : vector<8x128xf32>
    %c4 = arith.constant 4 : index
    %6 = memref.load %arg1[%c4] : memref<13xf32, #tpu.memory_space<smem>>
    %7 = vector.broadcast %6 : f32 to vector<8x128xf32>
    %8 = arith.addf %5, %7 : vector<8x128xf32>
    %cst = arith.constant 0.000000e+00 : f32
    %9 = vector.broadcast %cst : f32 to vector<8x128xf32>
    %10 = arith.maximumf %8, %9 : vector<8x128xf32>
    %c8 = arith.constant 8 : index
    %11 = memref.load %arg1[%c8] : memref<13xf32, #tpu.memory_space<smem>>
    %12 = vector.broadcast %11 : f32 to vector<8x128xf32>
    %13 = arith.mulf %12, %10 : vector<8x128xf32>
    %14 = arith.addf %2, %13 : vector<8x128xf32>
    %c1 = arith.constant 1 : index
    %15 = memref.load %arg1[%c1] : memref<13xf32, #tpu.memory_space<smem>>
    %16 = vector.broadcast %15 : f32 to vector<8x128xf32>
    %17 = arith.mulf %0, %16 : vector<8x128xf32>
    %c5 = arith.constant 5 : index
    %18 = memref.load %arg1[%c5] : memref<13xf32, #tpu.memory_space<smem>>
    %19 = vector.broadcast %18 : f32 to vector<8x128xf32>
    %20 = arith.addf %17, %19 : vector<8x128xf32>
    %cst_2 = arith.constant 0.000000e+00 : f32
    %21 = vector.broadcast %cst_2 : f32 to vector<8x128xf32>
    %22 = arith.maximumf %20, %21 : vector<8x128xf32>
    %c9 = arith.constant 9 : index
    %23 = memref.load %arg1[%c9] : memref<13xf32, #tpu.memory_space<smem>>
    %24 = vector.broadcast %23 : f32 to vector<8x128xf32>
    %25 = arith.mulf %24, %22 : vector<8x128xf32>
    %26 = arith.addf %14, %25 : vector<8x128xf32>
    %c2 = arith.constant 2 : index
    %27 = memref.load %arg1[%c2] : memref<13xf32, #tpu.memory_space<smem>>
    %28 = vector.broadcast %27 : f32 to vector<8x128xf32>
    %29 = arith.mulf %0, %28 : vector<8x128xf32>
    %c6 = arith.constant 6 : index
    %30 = memref.load %arg1[%c6] : memref<13xf32, #tpu.memory_space<smem>>
    %31 = vector.broadcast %30 : f32 to vector<8x128xf32>
    %32 = arith.addf %29, %31 : vector<8x128xf32>
    %cst_3 = arith.constant 0.000000e+00 : f32
    %33 = vector.broadcast %cst_3 : f32 to vector<8x128xf32>
    %34 = arith.maximumf %32, %33 : vector<8x128xf32>
    %c10 = arith.constant 10 : index
    %35 = memref.load %arg1[%c10] : memref<13xf32, #tpu.memory_space<smem>>
    %36 = vector.broadcast %35 : f32 to vector<8x128xf32>
    %37 = arith.mulf %36, %34 : vector<8x128xf32>
    %38 = arith.addf %26, %37 : vector<8x128xf32>
    %c3 = arith.constant 3 : index
    %39 = memref.load %arg1[%c3] : memref<13xf32, #tpu.memory_space<smem>>
    %40 = vector.broadcast %39 : f32 to vector<8x128xf32>
    %41 = arith.mulf %0, %40 : vector<8x128xf32>
    %c7 = arith.constant 7 : index
    %42 = memref.load %arg1[%c7] : memref<13xf32, #tpu.memory_space<smem>>
    %43 = vector.broadcast %42 : f32 to vector<8x128xf32>
    %44 = arith.addf %41, %43 : vector<8x128xf32>
    %cst_4 = arith.constant 0.000000e+00 : f32
    %45 = vector.broadcast %cst_4 : f32 to vector<8x128xf32>
    %46 = arith.maximumf %44, %45 : vector<8x128xf32>
    %c11 = arith.constant 11 : index
    %47 = memref.load %arg1[%c11] : memref<13xf32, #tpu.memory_space<smem>>
    %48 = vector.broadcast %47 : f32 to vector<8x128xf32>
    %49 = arith.mulf %48, %46 : vector<8x128xf32>
    %50 = arith.addf %38, %49 : vector<8x128xf32>
    %c0_5 = arith.constant 0 : index
    %c0_6 = arith.constant 0 : index
    %51 = vector.load %arg3[%c0_5, %c0_6] : memref<8x128xf32, #tpu.memory_space<vmem>>, vector<8x128xf32>
    tpu.vector_store %arg3[%c0_5, %c0_6], %50 {strides = array<i32>} : memref<8x128xf32, #tpu.memory_space<vmem>>, vector<8x128xf32>,
    return
  }
  func.func @transform_0(%arg0: i32) -> i32 {
    %c0_i32 = arith.constant 0 : i32
    %c0_i32_0 = arith.constant 0 : i32
    return %c0_i32 : i32
  }
  func.func @transform_1(%arg0: i32) -> (i32, i32) {
    %c0_i32 = arith.constant 0 : i32
    %c0_i32_0 = arith.constant 0 : i32
    return %arg0, %c0_i32 : i32, i32
  }
  func.func @transform_2(%arg0: i32) -> (i32, i32) {
    %c0_i32 = arith.constant 0 : i32
    %c0_i32_0 = arith.constant 0 : i32
    return %arg0, %c0_i32 : i32, i32
  }
}

</mosaic_0001>

<bundles_post_ra>
// kernel: tpu_custom_call.1
= control target key start
LH: loop header
LB: loop body
LE: loop exit
PB: predicated region body
PF: predicated region fallthrough
CT: control target
= control target key end

     0   :  { %7 = vsyncpa [#allocation4], 0  ;;  %s167_s0 = inlined_call_operand.hbm [shape: f32[13], index: 0, kind: input, shape index: {}]   ;;  %s168_s1 = inlined_call_operand.vmem [shape: f32[1,128], index: 1, kind: input, shape index: {}]   ;;  %s169_s2 = inlined_call_operand.hbm [shape: f32[1,128], index: 2, kind: output, shape index: {}]  }
   0x1   :  { %8 = vsyncpa [#allocation3], 0  ;;  %s136_s9 = smov [#allocation2]  }
   0x2   :  { %16 = dma.hbm_to_smem %s167_s0, 16, %s136_s9, [#allocation4]  }
   0x3   :  { %132 = dma.done.wait [#allocation4], 16  }
   0x4   :  { %133 = vsyncadd [#allocation4], 4294967280 }
   0x5   :  { %22 = sfence }
   0x6   :  { %s158_s12 = sld [smem:[#allocation2 + $0xc]]  ;;  %v23_v0 = vld [vmem:[%s168_s1] sm:$0xff] }
   0x7   :  { %s26_s13 = sld [smem:[#allocation2]] }
   0x8   :  { %s89_s14 = sld [smem:[#allocation2 + $0x4]] }
   0x9   :  { %s90_s15 = sld [smem:[#allocation2 + $0x8]] }
   0xa   :  { %s91_s16 = sld [smem:[#allocation2 + $0x1]] }
   0xb   :  { %s92_s19 = sld [smem:[#allocation2 + $0x5]] }
   0xc   :  { %s93_s20 = sld [smem:[#allocation2 + $0x9]]  ;;  %v25_v10 = vstv %s158_s12 }
   0xd   :  { %v27_v1 = vstv %s26_s13  ;;  %s94_s21 = sld [smem:[#allocation2 + $0x2]] }
   0xe   :  { %v28_v2 = vmul.f32 %v27_v1, %v23_v0  ;;  %v30_v3 = vstv %s89_s14  ;;  %s95_s0 = sld [smem:[#allocation2 + $0x6]] }
   0xf   :  { %s96_s22 = sld [smem:[#allocation2 + $0xa]]  ;;  %v34_v6 = vstv %s90_s15 }
  0x10   :  { %v31_v4 = vadd.f32 %v30_v3, %v28_v2  ;;  %v38_v5 = vstv %s91_s16  ;;  %s97_s23 = sld [smem:[#allocation2 + $0x3]] }
  0x11   :  { %v39_v7 = vmul.f32 %v38_v5, %v23_v0  ;;  %v41_v8 = vstv %s92_s19  ;;  %s98_s24 = sld [smem:[#allocation2 + $0x7]] }
  0x12   :  { %v32_v9 = vmax.f32 %v31_v4, 0.0  ;;  %s99_s25 = sld [smem:[#allocation2 + $0xb]]  ;;  %v45_v14 = vstv %s93_s20 }
  0x13   :  { %v42_v11 = vadd.f32 %v41_v8, %v39_v7  ;;  %v49_v12 = vstv %s94_s21 }
  0x14   :  { %v35_v13 = vmul.f32 %v34_v6, %v32_v9  ;;  %v50_v15 = vmul.f32 %v49_v12, %v23_v0  ;;  %v52_v16 = vstv %s95_s0 }
  0x15   :  { %v43_v17 = vmax.f32 %v42_v11, 0.0  ;;  %v56_v22 = vstv %s96_s22 }
  0x16   :  { %v36_v18 = vadd.f32 %v35_v13, %v25_v10  ;;  %v53_v19 = vadd.f32 %v52_v16, %v50_v15  ;;  %v60_v20 = vstv %s97_s23 }
  0x17   :  { %v46_v21 = vmul.f32 %v45_v14, %v43_v17  ;;  %v61_v23 = vmul.f32 %v60_v20, %v23_v0  ;;  %v63_v24 = vstv %s98_s24 }
  0x18   :  { %v54_v25 = vmax.f32 %v53_v19, 0.0  ;;  %v67_v29 = vstv %s99_s25 }
  0x19   :  { %v47_v26 = vadd.f32 %v46_v21, %v36_v18  ;;  %v64_v27 = vadd.f32 %v63_v24, %v61_v23 }
  0x1a   :  { %v57_v28 = vmul.f32 %v56_v22, %v54_v25 }
  0x1b   :  { %v65_v30 = vmax.f32 %v64_v27, 0.0 }
  0x1c   :  { %v58_v31 = vadd.f32 %v57_v28, %v47_v26 }
  0x1d   :  { %v68_v32 = vmul.f32 %v67_v29, %v65_v30 }
  0x1f   :  { %v69_v33 = vadd.f32 %v68_v32, %v58_v31 }
  0x21   :  { %70 = vst [vmem:[#allocation5] sm:$0xff] %v69_v33 }
  0x22   :  { %75 = vsyncadd [#allocation3], 112  ;;  %s137_s1 = smov [#allocation5]  }
  0x23   :  { %s76_s26 = sshll.u32 %s137_s1, 4  ;;  %s77_s26 = int_to_ptr.vmem [resolvable:$true] %s76_s26 }
  0x24   :  { %s112_s27 = scalar_lea.vmem %s77_s26, 16  ;;  %s116_s28 = scalar_lea.vmem %s77_s26, 128 }
  0x25   :  { %p113_p0 = scmp.ne.s32.totalorder %s77_s26, %s112_s27  ;;  %p117_p1 = scmp.lt.s32.totalorder %s77_s26, %s77_s26 }
  0x26   :  { %p118_p2 = scmp.lt.s32.totalorder %s116_s28, %s112_s27 }
  0x28   :  { %p119_p3 = por %p118_p2, %p117_p1 }
  0x2a   :  { %p120_p4 = pnand %p119_p3, %p113_p0 }
  0x2c   :  { %123 = shalt.err (!%p120_p4)
}
  0x2d   :  { %s138_s29 = smov 16   ;;  %s139_s30 = smov 1  }
  0x2e   :  { %82 = dma.vmem_to_hbm [thread:$0]  %s77_s26, 16, %s169_s2, [#allocation3], %s138_s29, %s138_s29, %s139_s30  }
  0x2f   :  { %134 = dma.done.wait [#allocation3], 128  }
  0x30   :  { %135 = vsyncadd [#allocation3], 4294967168 }
  0x31   :  { %86 = vsyncpa [#allocation3], 1 }
  0x32   :  { %87 = vsyncpa [#allocation4], 1 }

</bundles_post_ra>
